<compile_context>
chip_gen: v5e
topology: v5e:2x2
jax: 0.10.0
libtpu: 0.0.40
codegen_flags: <defaults>
</compile_context>

<pallas_src>
import jax
import jax.numpy as jnp
from jax.experimental import pallas as pl
from jax.experimental.pallas import tpu as pltpu

LANES = 128             # lane tile (last dim)
SUBLANES = 8            # sublane tile (second-to-last dim)
ELEMS_PER_TILE = SUBLANES * LANES          # 1024 elements per (8,128) vreg tile
SMALL_TILES_MAX = 512   # <= 512 vreg tiles (4096 rows, 2 MiB f32/operand): one block
TILE_T_BIG = 512        # vreg tiles per grid step on the tiled path (4096 rows)


def _bce_per_elem(p_ref, y_ref):
    p = p_ref[...].astype(jnp.float32)
    y = y_ref[...].astype(jnp.float32)
    # PyTorch BCELoss clamps each log term at -100 (valid for soft targets too).
    log_p = jnp.maximum(jnp.log(p), -100.0)
    log_1mp = jnp.maximum(jnp.log1p(-p), -100.0)
    return -(y * log_p + (1.0 - y) * log_1mp)


def _bce_sum_single_kernel(p_ref, y_ref, out_ref):
    """Single grid step: whole array in one (rows,128) block; reduce to SMEM scalar."""
    out_ref[0, 0] = jnp.sum(_bce_per_elem(p_ref, y_ref))


def _bce_partial_kernel(p_ref, y_ref, out_ref):
    """One independent grid step: (T,8,128) tile -> lane-dense (1,8,128) partial sum.
    Pure VPU adds (reduction over the non-layout leading axis); no cross-lane work,
    no carried state, so the grid axis can be megacore-parallel."""
    out_ref[...] = jnp.sum(_bce_per_elem(p_ref, y_ref), axis=0, keepdims=True)


def _bce_mean_pallas(pred, target):
    """Mean BCE over all elements via a Pallas reduction."""
    n = pred.size
    p_flat = pred.reshape(-1)
    y_flat = target.reshape(-1)

    tiles_needed = -(-n // ELEMS_PER_TILE)            # ceil-div to whole vreg tiles
    if tiles_needed <= SMALL_TILES_MAX:
        tiles = tiles_needed
        grid_steps = 1
    else:
        grid_steps = -(-tiles_needed // TILE_T_BIG)
        tiles = grid_steps * TILE_T_BIG

    pad = tiles * ELEMS_PER_TILE - n
    if pad:
        # (p=1, y=1) padding contributes exactly 0 to the BCE sum.
        p_flat = jnp.concatenate([p_flat, jnp.ones((pad,), p_flat.dtype)])
        y_flat = jnp.concatenate([y_flat, jnp.ones((pad,), y_flat.dtype)])

    itemsize = jnp.dtype(p_flat.dtype).itemsize + jnp.dtype(y_flat.dtype).itemsize
    n_pad = tiles * ELEMS_PER_TILE

    if grid_steps == 1:
        # --- small path: one block, direct scalar reduce, no extra launches ---
        rows = tiles * SUBLANES
        p2d = p_flat.reshape(rows, LANES)
        y2d = y_flat.reshape(rows, LANES)
        total = pl.pallas_call(
            _bce_sum_single_kernel,
            out_shape=jax.ShapeDtypeStruct((1, 1), jnp.float32),
            grid_spec=pltpu.PrefetchScalarGridSpec(
                num_scalar_prefetch=0,
                grid=(1,),
                in_specs=[
                    pl.BlockSpec((rows, LANES), lambda i: (0, 0)),
                    pl.BlockSpec((rows, LANES), lambda i: (0, 0)),
                ],
                out_specs=pl.BlockSpec(memory_space=pltpu.SMEM),
            ),
            compiler_params=pltpu.CompilerParams(
                dimension_semantics=("arbitrary",)),
            cost_estimate=pl.CostEstimate(
                flops=6 * n_pad, transcendentals=2 * n_pad,
                bytes_accessed=n_pad * itemsize + 4),
        )(p2d, y2d)
        return total[0, 0] / jnp.float32(n)

    # --- large path: independent ("parallel") grid steps, lane-dense partials ---
    p3 = p_flat.reshape(tiles, SUBLANES, LANES)
    y3 = y_flat.reshape(tiles, SUBLANES, LANES)
    partials = pl.pallas_call(
        _bce_partial_kernel,
        out_shape=jax.ShapeDtypeStruct((grid_steps, SUBLANES, LANES), jnp.float32),
        grid_spec=pltpu.PrefetchScalarGridSpec(
            num_scalar_prefetch=0,
            grid=(grid_steps,),
            in_specs=[
                pl.BlockSpec((TILE_T_BIG, SUBLANES, LANES), lambda i: (i, 0, 0)),
                pl.BlockSpec((TILE_T_BIG, SUBLANES, LANES), lambda i: (i, 0, 0)),
            ],
            out_specs=pl.BlockSpec((1, SUBLANES, LANES), lambda i: (i, 0, 0)),
        ),
        compiler_params=pltpu.CompilerParams(
            dimension_semantics=("parallel",)),   # v7x: shard HBM scan over both TCs
        cost_estimate=pl.CostEstimate(
            flops=6 * n_pad, transcendentals=2 * n_pad,
            bytes_accessed=n_pad * itemsize + grid_steps * ELEMS_PER_TILE * 4),
    )(p3, y3)
    # Tiny final reduce over (grid_steps, 8, 128) partials; negligible vs HBM scan.
    return jnp.sum(partials) / jnp.float32(n)


def loss_funcation_forward(data_batch, pred_output, output):
    """Mirrors loss_funcation.forward: returns (loss, {'loss': loss})."""
    _ = data_batch[0].shape[1]  # batch_size, read but unused (as in PyTorch)
    loss = _bce_mean_pallas(pred_output, output)
    return loss, {"loss": loss}


def _bce_ref(p, y):
    return jnp.mean(
        -(y * jnp.maximum(jnp.log(p), -100.0)
          + (1.0 - y) * jnp.maximum(jnp.log1p(-p), -100.0)))


if __name__ == "__main__":
    key = jax.random.PRNGKey(0)
    k1, k2, k3, k4, k5, k6, k7 = jax.random.split(key, 7)

    # --- primary demo: NCHW-like (2, 4, 16, 16) probabilities / binary targets
    shape = (2, 4, 16, 16)
    pred_output = jax.nn.sigmoid(jax.random.normal(k1, shape, dtype=jnp.float32))
    output = jax.random.bernoulli(k2, p=0.5, shape=shape).astype(jnp.float32)
    # data_batch: tuple of tensors; only shape[1] of the first is inspected
    data_batch = (jax.random.normal(k3, (8, 2, 32), dtype=jnp.float32),)

    loss, loss_dict = loss_funcation_forward(data_batch, pred_output, output)
    loss = jax.block_until_ready(loss)
    ref = _bce_ref(pred_output, output)
    assert jnp.allclose(loss, ref, rtol=1e-5, atol=1e-6), (loss, ref)
    assert jnp.allclose(loss_dict["loss"], loss)

    # --- ragged small shape: exercises zero-contribution padding (single block)
    shape_r = (2, 3, 7, 11)
    p_r = jax.nn.sigmoid(jax.random.normal(k4, shape_r, dtype=jnp.float32))
    y_r = jax.random.uniform(k5, shape_r, dtype=jnp.float32)  # soft targets
    loss_r, _ = loss_funcation_forward(data_batch, p_r, y_r)
    loss_r = jax.block_until_ready(loss_r)
    assert jnp.allclose(loss_r, _bce_ref(p_r, y_r), rtol=1e-5, atol=1e-5), loss_r

    # --- larger shape: exercises the parallel tiled path (2 grid steps)
    shape_b = (4, 16, 128, 128)
    p_b = jax.nn.sigmoid(jax.random.normal(k6, shape_b, dtype=jnp.float32))
    y_b = jax.random.uniform(k7, shape_b, dtype=jnp.float32)  # soft targets
    loss_b, _ = loss_funcation_forward(data_batch, p_b, y_b)
    loss_b = jax.block_until_ready(loss_b)
    assert jnp.allclose(loss_b, _bce_ref(p_b, y_b), rtol=1e-4, atol=1e-4), loss_b

    print("KERNEL_OK")
</pallas_src>

<mosaic_0001>
module attributes {stable_mosaic.version = 11 : i64} {
  func.func @_bce_sum_single_kernel(%arg0: i32, %arg1: memref<16x128xf32, #tpu.memory_space<vmem>>, %arg2: memref<16x128xf32, #tpu.memory_space<vmem>>, %arg3: memref<1x1xf32, #tpu.memory_space<smem>>) attributes {dimension_semantics = [#tpu.dimension_semantics<arbitrary>], iteration_bounds = array<i64: 1>, scalar_prefetch = 0 : i64, scratch_operands = 0 : i64, tpu.core_type = #tpu.core_type<tc>, window_params = [{pipeline_mode = #tpu.pipeline_mode<synchronous>, transform_indices = @transform_0, window_bounds = array<i64: 16, 128>}, {pipeline_mode = #tpu.pipeline_mode<synchronous>, transform_indices = @transform_1, window_bounds = array<i64: 16, 128>}, {transform_indices = @transform_2, window_bounds = array<i64: 1, 1>}]} {
    %c0 = arith.constant 0 : index
    %c0_0 = arith.constant 0 : index
    %0 = vector.load %arg1[%c0, %c0_0] : memref<16x128xf32, #tpu.memory_space<vmem>>, vector<16x128xf32>
    %c0_1 = arith.constant 0 : index
    %c0_2 = arith.constant 0 : index
    %1 = vector.load %arg2[%c0_1, %c0_2] : memref<16x128xf32, #tpu.memory_space<vmem>>, vector<16x128xf32>
    %2 = math.log %0 : vector<16x128xf32>
    %cst = arith.constant -1.000000e+02 : f32
    %3 = vector.broadcast %cst : f32 to vector<16x128xf32>
    %4 = arith.maximumf %2, %3 : vector<16x128xf32>
    %cst_3 = arith.constant 0.000000e+00 : f32
    %5 = vector.broadcast %cst_3 : f32 to vector<16x128xf32>
    %6 = arith.subf %5, %0 : vector<16x128xf32>
    %7 = math.log1p %6 : vector<16x128xf32>
    %cst_4 = arith.constant -1.000000e+02 : f32
    %8 = vector.broadcast %cst_4 : f32 to vector<16x128xf32>
    %9 = arith.maximumf %7, %8 : vector<16x128xf32>
    %10 = arith.mulf %1, %4 : vector<16x128xf32>
    %cst_5 = arith.constant 1.000000e+00 : f32
    %11 = vector.broadcast %cst_5 : f32 to vector<16x128xf32>
    %12 = arith.subf %11, %1 : vector<16x128xf32>
    %13 = arith.mulf %12, %9 : vector<16x128xf32>
    %14 = arith.addf %10, %13 : vector<16x128xf32>
    %cst_6 = arith.constant 0.000000e+00 : f32
    %15 = vector.broadcast %cst_6 : f32 to vector<16x128xf32>
    %16 = arith.subf %15, %14 : vector<16x128xf32>
    %17 = vector.shape_cast %16 : vector<16x128xf32> to vector<1x16x128xf32>
    %cst_7 = arith.constant dense<0.000000e+00> : vector<1xf32>
    %18 = vector.multi_reduction <add>, %17, %cst_7 [1, 2] : vector<1x16x128xf32> to vector<1xf32>
    %19 = vector.shape_cast %18 : vector<1xf32> to vector<1x1x1xf32>
    %20 = vector.extract %19[0, 0, 0] : f32 from vector<1x1x1xf32>
    %c0_8 = arith.constant 0 : index
    %c0_9 = arith.constant 0 : index
    %21 = memref.load %arg3[%c0_8, %c0_9] : memref<1x1xf32, #tpu.memory_space<smem>>
    memref.store %20, %arg3[%c0_8, %c0_9] : memref<1x1xf32, #tpu.memory_space<smem>>
    return
  }
  func.func @transform_0(%arg0: i32) -> (i32, i32) {
    %c0_i32 = arith.constant 0 : i32
    %c0_i32_0 = arith.constant 0 : i32
    %c0_i32_1 = arith.constant 0 : i32
    return %c0_i32, %c0_i32_0 : i32, i32
  }
  func.func @transform_1(%arg0: i32) -> (i32, i32) {
    %c0_i32 = arith.constant 0 : i32
    %c0_i32_0 = arith.constant 0 : i32
    %c0_i32_1 = arith.constant 0 : i32
    return %c0_i32, %c0_i32_0 : i32, i32
  }
  func.func @transform_2(%arg0: i32) -> (i32, i32) {
    %c0_i32 = arith.constant 0 : i32
    %c0_i32_0 = arith.constant 0 : i32
    %c0_i32_1 = arith.constant 0 : i32
    return %c0_i32, %c0_i32_0 : i32, i32
  }
}

</mosaic_0001>

<bundles_post_ra>
// kernel: tpu_custom_call.1
= control target key start
LH: loop header
LB: loop body
LE: loop exit
PB: predicated region body
PF: predicated region fallthrough
CT: control target
= control target key end

     0   :  { %7 = vsyncpa [#allocation3], 0  ;;  %s225_s0 = inlined_call_operand.hbm [shape: f32[16,128], index: 0, kind: input, shape index: {}]   ;;  %s226_s1 = inlined_call_operand.hbm [shape: f32[16,128], index: 1, kind: input, shape index: {}]   ;;  %s227_s2 = inlined_call_operand.hbm [shape: f32[1,1], index: 2, kind: output, shape index: {}]  }
   0x1   :  { %8 = vsyncpa [#allocation6], 0 }
   0x2   :  { %9 = vsyncpa [#allocation4], 0  ;;  %s14_s11 = sshll.u32 %s225_s0, 4  ;;  %s196_s12 = smov [#allocation2]   ;;  %s15_s11 = int_to_ptr.hbm [resolvable:$true] %s14_s11 }
   0x3   :  { %s16_s13 = sshll.u32 %s196_s12, 4  ;;  %s27_s16 = sshll.u32 %s226_s1, 4  ;;  %s17_s13 = int_to_ptr.vmem [resolvable:$true] %s16_s13  ;;  %s28_s16 = int_to_ptr.hbm [resolvable:$true] %s27_s16 }
   0x4   :  { %s197_s17 = smov 128   ;;  %s198_s18 = smov 8  }
   0x5   :  { %22 = dma.hbm_to_vmem [thread:$0]  %s15_s11, 256, %s17_s13, [#allocation3], %s197_s17, %s197_s17, %s198_s18  }
   0x6   :  { %s199_s19 = smov [#allocation5]  }
   0x7   :  { %s29_s20 = sshll.u32 %s199_s19, 4  ;;  %s30_s20 = int_to_ptr.vmem [resolvable:$true] %s29_s20 }
   0x8   :  { %35 = dma.hbm_to_vmem [thread:$0]  %s28_s16, 256, %s30_s20, [#allocation6], %s197_s17, %s197_s17, %s198_s18  }
   0x9   :  { %190 = dma.done.wait [#allocation3], 256  }
   0xa   :  { %191 = vsyncadd [#allocation3], 4294967040 }
   0xb   :  { %192 = dma.done.wait [#allocation6], 256  }
   0xc   :  { %193 = vsyncadd [#allocation6], 4294967040  ;;  %v44_v0 = vld [vmem:[#allocation2] sm:$0xff]  ;;  %v45_v1 = vld [vmem:[#allocation2 + $0x8] sm:$0xff]  ;;  %s103_s21 = sshll.u32 %s227_s2, 4  ;;  %s200_s23 = smov [#allocation7]   ;;  %s104_s21 = int_to_ptr.hbm [resolvable:$true] %s103_s21 }
   0xd   :  { %122 = vlog2.f32 %v44_v0  ;;  %v54_v2 = vsub.f32 0.0, %v44_v0  ;;  %v55_v3 = vsub.f32 0.0, %v45_v1  ;;  %v46_v16 = vld [vmem:[#allocation5] sm:$0xff]  ;;  %v47_v19 = vld [vmem:[#allocation5 + $0x8] sm:$0xff] }
   0xe   :  { %124 = vlog2.f32 %v45_v1  ;;  %v78_v26 = vsub.f32 1.0, %v46_v16  ;;  %v79_v28 = vsub.f32 1.0, %v47_v19 }
   0xf   :  { %v56_v4 = vadd.f32 1.0, %v54_v2  ;;  %v59_v5 = vmul.f32 -0.5, %v54_v2  ;;  %v65_v6 = vadd.f32 1.0, %v55_v3  ;;  %v68_v7 = vmul.f32 -0.5, %v55_v3 }
  0x10   :  { %v62_v10 = vand.u32 2147483647, %v54_v2  ;;  %v71_v14 = vand.u32 2147483647, %v55_v3 }
  0x11   :  { %126 = vlog2.f32 %v56_v4  ;;  %v60_v8 = vadd.f32 1.0, %v59_v5  ;;  %v69_v11 = vadd.f32 1.0, %v68_v7 }
  0x12   :  { %128 = vlog2.f32 %v65_v6  ;;  %vm63_vm0 = vcmp.lt.f32.partialorder %v62_v10, 0.0004427343  ;;  %vm72_vm1 = vcmp.lt.f32.partialorder %v71_v14, 0.0004427343 }
  0x13   :  { %v123_v9 = vpop.eup %122  ;;  %v61_v17 = vmul.f32 %v60_v8, %v54_v2  ;;  %v70_v21 = vmul.f32 %v69_v11, %v55_v3 }
  0x14   :  { %v125_v12 = vpop.eup %124  ;;  %v49_v13 = vmul.f32 0.6931472, %v123_v9 }
  0x15   :  { %v51_v15 = vmul.f32 0.6931472, %v125_v12 }
  0x16   :  { %v52_v20 = vmax.f32 %v49_v13, -100.0 }
  0x17   :  { %v127_v18 = vpop.eup %126  ;;  %v53_v23 = vmax.f32 %v51_v15, -100.0 }
  0x18   :  { %v129_v22 = vpop.eup %128  ;;  %v58_v24 = vmul.f32 0.6931472, %v127_v18  ;;  %v76_v31 = vmul.f32 %v52_v20, %v46_v16 }
  0x19   :  { %v67_v25 = vmul.f32 0.6931472, %v129_v22  ;;  %v77_v33 = vmul.f32 %v53_v23, %v47_v19 }
  0x1a   :  { %v64_v27 = vsel %vm63_vm0, %v61_v17, %v58_v24 }
  0x1b   :  { %v73_v29 = vsel %vm72_vm1, %v70_v21, %v67_v25  ;;  %v74_v30 = vmax.f32 %v64_v27, -100.0 }
  0x1c   :  { %v75_v32 = vmax.f32 %v73_v29, -100.0 }
  0x1d   :  { %v80_v34 = vmul.f32 %v78_v26, %v74_v30 }
  0x1e   :  { %v81_v35 = vmul.f32 %v79_v28, %v75_v32 }
  0x1f   :  { %v82_v36 = vadd.f32 %v80_v34, %v76_v31 }
  0x20   :  { %v83_v37 = vadd.f32 %v81_v35, %v77_v33 }
  0x21   :  { %v84_v38 = vsub.f32 0.0, %v82_v36 }
  0x22   :  { %v85_v39 = vsub.f32 0.0, %v83_v37 }
  0x24   :  { %v86_v40 = vadd.f32 %v85_v39, %v84_v38 }
  0x26   :  { %87 = vadd.xlane.f32.xlu0 %v86_v40 }
  0x99   :  { %v88_v41 = vpop.xlane.xlu0 %87 }
  0x9a   :  { %v89_v42 = vrot.slane %v88_v41, 4 }
  0x9c   :  { %v90_v43 = vadd.f32 %v89_v42, %v88_v41 }
  0x9e   :  { %v91_v44 = vrot.slane %v90_v43, 2 }
  0xa0   :  { %v92_v45 = vadd.f32 %v91_v44, %v90_v43 }
  0xa2   :  { %v93_v46 = vrot.slane %v92_v45, 1 }
  0xa4   :  { %v94_v47 = vadd.f32 %v93_v46, %v92_v45 }
  0xa6   :  { %115 = vpush %v94_v47 }
  0xd7   :  { %s116_s22 = spop %115 }
  0xd8   :  { %97 = sst [smem:[#allocation7]] %s116_s22 }
  0xd9   :  { %106 = dma.smem_to_hbm %s200_s23, 16, %s104_s21, [#allocation4]  }
  0xda   :  { %194 = dma.done.wait [#allocation4], 16  }
  0xdb   :  { %195 = vsyncadd [#allocation4], 4294967280 }
  0xdc   :  { %111 = sfence }
  0xdd   :  { %112 = vsyncpa [#allocation3], 1 }
  0xde   :  { %113 = vsyncpa [#allocation6], 1 }
  0xdf   :  { %114 = vsyncpa [#allocation4], 1 }

</bundles_post_ra>
